<compile_context>
chip_gen: v5e
topology: v5e:2x2
jax: 0.10.0
libtpu: 0.0.40
codegen_flags: <defaults>
</compile_context>

<pallas_src>
import functools

import jax
import jax.numpy as jnp
from jax.experimental import pallas as pl
from jax.experimental.pallas import tpu as pltpu

LANES = 128
SUB = 8                  # sublanes per vreg
MAX_BLOCK_ROWS = 4096    # rows of 128 lanes per grid step (2 MiB f32 per input buffer)
CHUNK_ROWS = 128         # fused-pass chunk: 16 vregs per f32 input -> no spills


def _round_up(a, b):
    return ((a + b - 1) // b) * b


@functools.lru_cache(maxsize=1)
def _max_shards():
    """2 shards only on megacore chips (2 TensorCores/device); 1 elsewhere."""
    try:
        kind = jax.devices()[0].device_kind.lower()
    except Exception:
        return 1
    if any(tag in kind for tag in ("v7", "7x", "v4", "v5p")):
        return 2
    return 1   # v5e / v6e (single TensorCore) and safe default


def _chunk_partials(x_ref, t_ref, r_start, nrows, row0, *, masked, rows,
                    binary_targets):
    """Process `nrows` rows starting at block-local row `r_start`.

    Returns four (SUB, LANES) f32 partial sums: x*t, x, t, +BCE-contribution
    (i.e. t*log(x) + (1-t)*log(1-x), clamped; negated once in the JAX combine).
    """
    x = x_ref[pl.ds(r_start, nrows), :].astype(jnp.float32)
    t = t_ref[pl.ds(r_start, nrows), :].astype(jnp.float32)

    if masked:
        # Row-granular mask against the true row count: rows beyond `rows` are
        # out-of-bounds garbage from the boundary block; force them to 0 so they
        # contribute exactly 0 to every accumulated term (lane-tail zero padding
        # inside valid rows already contributes 0 by construction).
        ridx = jax.lax.broadcasted_iota(jnp.int32, (nrows, LANES), 0)
        valid = (row0 + r_start + ridx) < rows
        x = jnp.where(valid, x, 0.0)
        t = jnp.where(valid, t, 0.0)

    if binary_targets:
        # Single-log fast path (valid only for hard 0/1 targets).
        bce = jnp.maximum(jnp.log(jnp.where(t > 0.5, x, 1.0 - x)), -100.0)
    else:
        # Dual-log path supports soft targets; clamp matches torch's BCE (-100).
        # NOTE: jnp.log(1-x) (not log1p) matches the torch reference exactly.
        log_x = jnp.maximum(jnp.log(x), -100.0)
        log_1mx = jnp.maximum(jnp.log(1.0 - x), -100.0)
        bce = log_1mx + t * (log_x - log_1mx)   # == t*log_x + (1-t)*log_1mx

    def fold(a):
        # (nrows, 128) -> (8, 128): pure cross-vreg VPU adds, no XLU traffic.
        return jnp.sum(a.reshape(nrows // SUB, SUB, LANES), axis=0)

    return fold(x * t), fold(x), fold(t), fold(bce)


def _dice_bce_partials_kernel(x_ref, t_ref, o_ref, *, rows, nblocks, block_rows,
                              chunk_rows, has_partial_tile, has_duplicate_tiles,
                              binary_targets):
    s = pl.program_id(0)
    i = pl.program_id(1)
    steps = pl.num_programs(1)

    # Zero the per-shard partial-sum block at the start of this shard's sweep.
    @pl.when(i == 0)
    def _():
        o_ref[...] = jnp.zeros_like(o_ref)

    blk = s * steps + i                 # unclamped block index (DMA map clamps)
    row0 = blk * block_rows             # global first row of this block

    n_full = block_rows // chunk_rows
    tail = block_rows - n_full * chunk_rows

    def accumulate(masked):
        zero = jnp.zeros((SUB, LANES), jnp.float32)
        carry = (zero, zero, zero, zero)

        def add_chunk(r_start, nrows, c):
            d0, d1, d2, d3 = _chunk_partials(
                x_ref, t_ref, r_start, nrows, row0,
                masked=masked, rows=rows, binary_targets=binary_targets)
            return (c[0] + d0, c[1] + d1, c[2] + d2, c[3] + d3)

        if n_full > 0:
            def body(c, carry):
                r = pl.multiple_of(c * chunk_rows, SUB)
                return add_chunk(r, chunk_rows, carry)
            unroll = n_full if n_full <= 4 else 4
            carry = jax.lax.fori_loop(0, n_full, body, carry, unroll=unroll)
        if tail:
            carry = add_chunk(n_full * chunk_rows, tail, carry)

        p_inter, p_x, p_t, p_bce = carry
        o_ref[0, 0, :, :] = o_ref[0, 0, :, :] + p_inter   # sum(x*t)
        o_ref[0, 1, :, :] = o_ref[0, 1, :, :] + p_x       # sum(x)
        o_ref[0, 2, :, :] = o_ref[0, 2, :, :] + p_t       # sum(t)
        o_ref[0, 3, :, :] = o_ref[0, 3, :, :] + p_bce     # +BCE sum

    def process_valid_block():
        if has_partial_tile:
            is_partial = (row0 + block_rows) > rows

            @pl.when(jnp.logical_not(is_partial))
            def _():
                accumulate(masked=False)       # hot path: no iota / where

            @pl.when(is_partial)
            def _():
                accumulate(masked=True)        # boundary tile only
        else:
            accumulate(masked=False)

    if has_duplicate_tiles:
        # Skip all compute for clamped duplicate tiles (shard overhang).
        @pl.when(blk < nblocks)
        def _():
            process_valid_block()
    else:
        process_valid_block()


def dice_bce_loss(inputs, targets, smooth=1.0, assume_binary_targets=False):
    """Pallas implementation of DiceBCELoss.forward (inputs are probabilities)."""
    x = jnp.ravel(inputs)
    t = jnp.ravel(targets)
    n = int(x.shape[0])

    # Lane alignment only; typical image tensors need no copy.
    padded = max(_round_up(n, LANES), SUB * LANES)
    if padded != n:
        # TODO(synk): this pad copies small / lane-unaligned inputs; aligned
        # inputs take the zero-copy path.
        x = jnp.pad(x, (0, padded - n))
        t = jnp.pad(t, (0, padded - n))
    rows = padded // LANES

    # Tile plan: multiple-of-8 row block, as large as possible up to 4096 rows.
    block_rows = min(MAX_BLOCK_ROWS, (rows // SUB) * SUB)
    nblocks = -(-rows // block_rows)
    num_shards = min(_max_shards(), nblocks)
    steps = -(-nblocks // num_shards)
    chunk_rows = min(CHUNK_ROWS, block_rows)

    x2 = x.reshape(rows, LANES)
    t2 = t.reshape(rows, LANES)

    def tile_map(s, i):
        # Clamp so DMA stays in-bounds; the kernel skips by the *unclamped* index.
        return (jnp.minimum(s * steps + i, nblocks - 1), 0)

    kernel = functools.partial(
        _dice_bce_partials_kernel,
        rows=rows, nblocks=nblocks, block_rows=block_rows, chunk_rows=chunk_rows,
        has_partial_tile=(rows % block_rows != 0),
        has_duplicate_tiles=(num_shards * steps > nblocks),
        binary_targets=bool(assume_binary_targets),
    )

    partials = pl.pallas_call(
        kernel,
        out_shape=jax.ShapeDtypeStruct((num_shards, 4, SUB, LANES), jnp.float32),
        grid_spec=pltpu.PrefetchScalarGridSpec(
            num_scalar_prefetch=0,
            grid=(num_shards, steps),
            in_specs=[
                pl.BlockSpec((block_rows, LANES), tile_map),
                pl.BlockSpec((block_rows, LANES), tile_map),
            ],
            out_specs=pl.BlockSpec((1, 4, SUB, LANES), lambda s, i: (s, 0, 0, 0)),
        ),
        compiler_params=pltpu.CompilerParams(
            dimension_semantics=("parallel", "arbitrary"),
            vmem_limit_bytes=32 * 1024 * 1024,
        ),
    )(x2, t2)

    # Tiny final cross-lane / cross-shard reduce + combine in plain JAX.
    sums = jnp.sum(partials, axis=(0, 2, 3))  # (4,)
    inter, sum_x, sum_t, bce_pos = sums[0], sums[1], sums[2], sums[3]
    smooth = jnp.float32(smooth)
    dice_loss = 1.0 - (2.0 * inter + smooth) / (sum_x + sum_t + smooth)
    bce_mean = -bce_pos / jnp.float32(n)      # single negation moved out of kernel
    return bce_mean + dice_loss


if __name__ == "__main__":
    key = jax.random.PRNGKey(0)
    k1, k2, k3, k4 = jax.random.split(key, 4)

    def ref_loss(x, t, smooth=1.0):
        xf = x.reshape(-1).astype(jnp.float32)
        tf = t.reshape(-1).astype(jnp.float32)
        inter = jnp.sum(xf * tf)
        dice = 1.0 - (2.0 * inter + smooth) / (jnp.sum(xf) + jnp.sum(tf) + smooth)
        bce = jnp.mean(-(tf * jnp.maximum(jnp.log(xf), -100.0)
                         + (1.0 - tf) * jnp.maximum(jnp.log(1.0 - xf), -100.0)))
        return bce + dice

    # Case 1: small NCHW segmentation-style tensors (probabilities after sigmoid).
    B, C, H, W = 2, 4, 16, 16
    inputs = jax.nn.sigmoid(jax.random.normal(k1, (B, C, H, W), dtype=jnp.float32))
    targets = (jax.random.uniform(k2, (B, C, H, W)) > 0.5).astype(jnp.float32)

    loss = dice_bce_loss(inputs, targets, smooth=1)
    jax.block_until_ready(loss)
    ref = ref_loss(inputs, targets)
    assert jnp.allclose(loss, ref, atol=1e-5, rtol=1e-5), (loss, ref)

    # Binary-target single-log fast path (targets here are exactly 0/1).
    loss_bin = dice_bce_loss(inputs, targets, smooth=1, assume_binary_targets=True)
    jax.block_until_ready(loss_bin)
    assert jnp.allclose(loss_bin, ref, atol=1e-5, rtol=1e-5), (loss_bin, ref)

    # Case 2: lane-aligned but sublane-ragged size -> multi-block grid with a
    # masked boundary tile (exercises the non-full-tile path).
    n2 = 13 * 128
    x2 = jax.nn.sigmoid(jax.random.normal(k3, (n2,), dtype=jnp.float32))
    t2 = (jax.random.uniform(k4, (n2,)) > 0.5).astype(jnp.float32)
    loss2 = dice_bce_loss(x2, t2, smooth=1)
    jax.block_until_ready(loss2)
    ref2 = ref_loss(x2, t2)
    assert jnp.allclose(loss2, ref2, atol=1e-5, rtol=1e-5), (loss2, ref2)

    print("KERNEL_OK")
</pallas_src>

<mosaic_0001>
module attributes {stable_mosaic.version = 11 : i64} {
  func.func @_dice_bce_partials_kernel(%arg0: i32, %arg1: i32, %arg2: memref<16x128xf32, #tpu.memory_space<vmem>>, %arg3: memref<16x128xf32, #tpu.memory_space<vmem>>, %arg4: memref<1x4x8x128xf32, #tpu.memory_space<vmem>>) attributes {dimension_semantics = [#tpu.dimension_semantics<parallel>, #tpu.dimension_semantics<arbitrary>], iteration_bounds = array<i64: 1, 1>, scalar_prefetch = 0 : i64, scratch_operands = 0 : i64, tpu.core_type = #tpu.core_type<tc>, window_params = [{transform_indices = @transform_0, window_bounds = array<i64: 16, 128>}, {transform_indices = @transform_1, window_bounds = array<i64: 16, 128>}, {transform_indices = @transform_2, window_bounds = array<i64: 1, 4, 8, 128>}]} {
    %c0_i32 = arith.constant 0 : i32
    %0 = arith.cmpi eq, %arg1, %c0_i32 : i32
    %1 = arith.extui %0 : i1 to i32
    %c0_i32_0 = arith.constant 0 : i32
    %2 = arith.cmpi ne, %1, %c0_i32_0 : i32
    scf.if %2 {
      %cst_39 = arith.constant 0.000000e+00 : f32
      %58 = vector.broadcast %cst_39 : f32 to vector<1x4x8x128xf32>
      %c0_40 = arith.constant 0 : index
      %c0_41 = arith.constant 0 : index
      %c0_42 = arith.constant 0 : index
      %c0_43 = arith.constant 0 : index
      %59 = vector.load %arg4[%c0_40, %c0_41, %c0_42, %c0_43] : memref<1x4x8x128xf32, #tpu.memory_space<vmem>>, vector<1x4x8x128xf32>
      tpu.vector_store %arg4[%c0_40, %c0_41, %c0_42, %c0_43], %58 {strides = array<i32>} : memref<1x4x8x128xf32, #tpu.memory_space<vmem>>, vector<1x4x8x128xf32>,
    } else {
    }
    %cst = arith.constant 0.000000e+00 : f32
    %3 = vector.broadcast %cst : f32 to vector<8x128xf32>
    %c0_i32_1 = arith.constant 0 : i32
    %c16_i32 = arith.constant 16 : i32
    %4 = arith.muli %c0_i32_1, %c16_i32 : i32
    %5 = tpu.assume_multiple %4, 8 : i32
    %6 = arith.index_cast %5 : i32 to index
    %c0 = arith.constant 0 : index
    %7 = vector.load %arg2[%6, %c0] : memref<16x128xf32, #tpu.memory_space<vmem>>, vector<16x128xf32>
    %8 = arith.index_cast %5 : i32 to index
    %c0_2 = arith.constant 0 : index
    %9 = vector.load %arg3[%8, %c0_2] : memref<16x128xf32, #tpu.memory_space<vmem>>, vector<16x128xf32>
    %10 = math.log %7 : vector<16x128xf32>
    %cst_3 = arith.constant -1.000000e+02 : f32
    %11 = vector.broadcast %cst_3 : f32 to vector<16x128xf32>
    %12 = arith.maximumf %10, %11 : vector<16x128xf32>
    %cst_4 = arith.constant 1.000000e+00 : f32
    %13 = vector.broadcast %cst_4 : f32 to vector<16x128xf32>
    %14 = arith.subf %13, %7 : vector<16x128xf32>
    %15 = math.log %14 : vector<16x128xf32>
    %cst_5 = arith.constant -1.000000e+02 : f32
    %16 = vector.broadcast %cst_5 : f32 to vector<16x128xf32>
    %17 = arith.maximumf %15, %16 : vector<16x128xf32>
    %18 = arith.subf %12, %17 : vector<16x128xf32>
    %19 = arith.mulf %9, %18 : vector<16x128xf32>
    %20 = arith.addf %17, %19 : vector<16x128xf32>
    %21 = arith.mulf %7, %9 : vector<16x128xf32>
    %22 = vector.shape_cast %21 : vector<16x128xf32> to vector<2x8x128xf32>
    %cst_6 = arith.constant dense<0.000000e+00> : vector<8x128xf32>
    %23 = vector.multi_reduction <add>, %22, %cst_6 [0] : vector<2x8x128xf32> to vector<8x128xf32>
    %24 = vector.shape_cast %7 : vector<16x128xf32> to vector<2x8x128xf32>
    %cst_7 = arith.constant dense<0.000000e+00> : vector<8x128xf32>
    %25 = vector.multi_reduction <add>, %24, %cst_7 [0] : vector<2x8x128xf32> to vector<8x128xf32>
    %26 = vector.shape_cast %9 : vector<16x128xf32> to vector<2x8x128xf32>
    %cst_8 = arith.constant dense<0.000000e+00> : vector<8x128xf32>
    %27 = vector.multi_reduction <add>, %26, %cst_8 [0] : vector<2x8x128xf32> to vector<8x128xf32>
    %28 = vector.shape_cast %20 : vector<16x128xf32> to vector<2x8x128xf32>
    %cst_9 = arith.constant dense<0.000000e+00> : vector<8x128xf32>
    %29 = vector.multi_reduction <add>, %28, %cst_9 [0] : vector<2x8x128xf32> to vector<8x128xf32>
    %30 = arith.addf %3, %23 : vector<8x128xf32>
    %31 = arith.addf %3, %25 : vector<8x128xf32>
    %32 = arith.addf %3, %27 : vector<8x128xf32>
    %33 = arith.addf %3, %29 : vector<8x128xf32>
    %c1_i32 = arith.constant 1 : i32
    %c0_10 = arith.constant 0 : index
    %c0_11 = arith.constant 0 : index
    %c0_12 = arith.constant 0 : index
    %c0_13 = arith.constant 0 : index
    %34 = vector.load %arg4[%c0_10, %c0_11, %c0_12, %c0_13] : memref<1x4x8x128xf32, #tpu.memory_space<vmem>>, vector<1x1x8x128xf32>
    %35 = vector.shape_cast %34 : vector<1x1x8x128xf32> to vector<8x128xf32>
    %36 = arith.addf %35, %30 : vector<8x128xf32>
    %c0_14 = arith.constant 0 : index
    %c0_15 = arith.constant 0 : index
    %c0_16 = arith.constant 0 : index
    %c0_17 = arith.constant 0 : index
    %37 = vector.load %arg4[%c0_14, %c0_15, %c0_16, %c0_17] : memref<1x4x8x128xf32, #tpu.memory_space<vmem>>, vector<1x1x8x128xf32>
    %38 = vector.shape_cast %37 : vector<1x1x8x128xf32> to vector<8x128xf32>
    %39 = vector.shape_cast %36 : vector<8x128xf32> to vector<1x1x8x128xf32>
    tpu.vector_store %arg4[%c0_14, %c0_15, %c0_16, %c0_17], %39 {strides = array<i32>} : memref<1x4x8x128xf32, #tpu.memory_space<vmem>>, vector<1x1x8x128xf32>,
    %c0_18 = arith.constant 0 : index
    %c1 = arith.constant 1 : index
    %c0_19 = arith.constant 0 : index
    %c0_20 = arith.constant 0 : index
    %40 = vector.load %arg4[%c0_18, %c1, %c0_19, %c0_20] : memref<1x4x8x128xf32, #tpu.memory_space<vmem>>, vector<1x1x8x128xf32>
    %41 = vector.shape_cast %40 : vector<1x1x8x128xf32> to vector<8x128xf32>
    %42 = arith.addf %41, %31 : vector<8x128xf32>
    %c0_21 = arith.constant 0 : index
    %c1_22 = arith.constant 1 : index
    %c0_23 = arith.constant 0 : index
    %c0_24 = arith.constant 0 : index
    %43 = vector.load %arg4[%c0_21, %c1_22, %c0_23, %c0_24] : memref<1x4x8x128xf32, #tpu.memory_space<vmem>>, vector<1x1x8x128xf32>
    %44 = vector.shape_cast %43 : vector<1x1x8x128xf32> to vector<8x128xf32>
    %45 = vector.shape_cast %42 : vector<8x128xf32> to vector<1x1x8x128xf32>
    tpu.vector_store %arg4[%c0_21, %c1_22, %c0_23, %c0_24], %45 {strides = array<i32>} : memref<1x4x8x128xf32, #tpu.memory_space<vmem>>, vector<1x1x8x128xf32>,
    %c0_25 = arith.constant 0 : index
    %c2 = arith.constant 2 : index
    %c0_26 = arith.constant 0 : index
    %c0_27 = arith.constant 0 : index
    %46 = vector.load %arg4[%c0_25, %c2, %c0_26, %c0_27] : memref<1x4x8x128xf32, #tpu.memory_space<vmem>>, vector<1x1x8x128xf32>
    %47 = vector.shape_cast %46 : vector<1x1x8x128xf32> to vector<8x128xf32>
    %48 = arith.addf %47, %32 : vector<8x128xf32>
    %c0_28 = arith.constant 0 : index
    %c2_29 = arith.constant 2 : index
    %c0_30 = arith.constant 0 : index
    %c0_31 = arith.constant 0 : index
    %49 = vector.load %arg4[%c0_28, %c2_29, %c0_30, %c0_31] : memref<1x4x8x128xf32, #tpu.memory_space<vmem>>, vector<1x1x8x128xf32>
    %50 = vector.shape_cast %49 : vector<1x1x8x128xf32> to vector<8x128xf32>
    %51 = vector.shape_cast %48 : vector<8x128xf32> to vector<1x1x8x128xf32>
    tpu.vector_store %arg4[%c0_28, %c2_29, %c0_30, %c0_31], %51 {strides = array<i32>} : memref<1x4x8x128xf32, #tpu.memory_space<vmem>>, vector<1x1x8x128xf32>,
    %c0_32 = arith.constant 0 : index
    %c3 = arith.constant 3 : index
    %c0_33 = arith.constant 0 : index
    %c0_34 = arith.constant 0 : index
    %52 = vector.load %arg4[%c0_32, %c3, %c0_33, %c0_34] : memref<1x4x8x128xf32, #tpu.memory_space<vmem>>, vector<1x1x8x128xf32>
    %53 = vector.shape_cast %52 : vector<1x1x8x128xf32> to vector<8x128xf32>
    %54 = arith.addf %53, %33 : vector<8x128xf32>
    %c0_35 = arith.constant 0 : index
    %c3_36 = arith.constant 3 : index
    %c0_37 = arith.constant 0 : index
    %c0_38 = arith.constant 0 : index
    %55 = vector.load %arg4[%c0_35, %c3_36, %c0_37, %c0_38] : memref<1x4x8x128xf32, #tpu.memory_space<vmem>>, vector<1x1x8x128xf32>
    %56 = vector.shape_cast %55 : vector<1x1x8x128xf32> to vector<8x128xf32>
    %57 = vector.shape_cast %54 : vector<8x128xf32> to vector<1x1x8x128xf32>
    tpu.vector_store %arg4[%c0_35, %c3_36, %c0_37, %c0_38], %57 {strides = array<i32>} : memref<1x4x8x128xf32, #tpu.memory_space<vmem>>, vector<1x1x8x128xf32>,
    return
  }
  func.func @transform_0(%arg0: i32, %arg1: i32) -> (i32, i32) {
    %c1_i32 = arith.constant 1 : i32
    %0 = arith.muli %arg0, %c1_i32 : i32
    %1 = arith.addi %0, %arg1 : i32
    %c0_i32 = arith.constant 0 : i32
    %2 = arith.minsi %1, %c0_i32 : i32
    %c0_i32_0 = arith.constant 0 : i32
    %c0_i32_1 = arith.constant 0 : i32
    return %2, %c0_i32_0 : i32, i32
  }
  func.func @transform_1(%arg0: i32, %arg1: i32) -> (i32, i32) {
    %c1_i32 = arith.constant 1 : i32
    %0 = arith.muli %arg0, %c1_i32 : i32
    %1 = arith.addi %0, %arg1 : i32
    %c0_i32 = arith.constant 0 : i32
    %2 = arith.minsi %1, %c0_i32 : i32
    %c0_i32_0 = arith.constant 0 : i32
    %c0_i32_1 = arith.constant 0 : i32
    return %2, %c0_i32_0 : i32, i32
  }
  func.func @transform_2(%arg0: i32, %arg1: i32) -> (i32, i32, i32, i32) {
    %c0_i32 = arith.constant 0 : i32
    %c0_i32_0 = arith.constant 0 : i32
    %c0_i32_1 = arith.constant 0 : i32
    %c0_i32_2 = arith.constant 0 : i32
    return %arg0, %c0_i32, %c0_i32_0, %c0_i32_1 : i32, i32, i32, i32
  }
}

</mosaic_0001>

<bundles_post_ra>
// kernel: tpu_custom_call.1
= control target key start
LH: loop header
LB: loop body
LE: loop exit
PB: predicated region body
PF: predicated region fallthrough
CT: control target
= control target key end

     0   :  { %7 = vsyncpa [#allocation3], 0  ;;  %s275_s0 = inlined_call_operand.hbm [shape: f32[16,128], index: 0, kind: input, shape index: {}]   ;;  %s276_s1 = inlined_call_operand.hbm [shape: f32[16,128], index: 1, kind: input, shape index: {}]   ;;  %s277_s2 = inlined_call_operand.hbm [shape: f32[1,4,8,128], index: 2, kind: output, shape index: {}]  }
   0x1   :  { %8 = vsyncpa [#allocation6], 0 }
   0x2   :  { %9 = vsyncpa [#allocation4], 0  ;;  %s20_s11 = sshll.u32 %s275_s0, 4  ;;  %s237_s12 = smov [#allocation2]   ;;  %s21_s11 = int_to_ptr.hbm [resolvable:$true] %s20_s11 }
   0x3   :  { %s22_s13 = sshll.u32 %s237_s12, 4  ;;  %s39_s16 = sshll.u32 %s276_s1, 4  ;;  %s23_s13 = int_to_ptr.vmem [resolvable:$true] %s22_s13  ;;  %s40_s16 = int_to_ptr.hbm [resolvable:$true] %s39_s16 }
   0x4   :  { %s238_s17 = smov 128   ;;  %s239_s18 = smov 8  }
   0x5   :  { %28 = dma.hbm_to_vmem [thread:$0]  %s21_s11, 256, %s23_s13, [#allocation3], %s238_s17, %s238_s17, %s239_s18  }
   0x6   :  { %s240_s19 = smov [#allocation5]  }
   0x7   :  { %s41_s20 = sshll.u32 %s240_s19, 4  ;;  %s42_s20 = int_to_ptr.vmem [resolvable:$true] %s41_s20 }
   0x8   :  { %47 = dma.hbm_to_vmem [thread:$0]  %s40_s16, 256, %s42_s20, [#allocation6], %s238_s17, %s238_s17, %s239_s18  }
   0x9   :  { %231 = dma.done.wait [#allocation3], 256  }
   0xa   :  { %232 = vsyncadd [#allocation3], 4294967040 }
   0xb   :  { %233 = dma.done.wait [#allocation6], 256  }
   0xc   :  { %234 = vsyncadd [#allocation6], 4294967040  ;;  %v72_v0 = vld [vmem:[#allocation2] sm:$0xff]  ;;  %v73_v1 = vld [vmem:[#allocation2 + $0x8] sm:$0xff]  ;;  %s241_s0 = smov [#allocation7]   ;;  %s127_s23 = sshll.u32 %s277_s2, 4  ;;  %s128_s23 = int_to_ptr.hbm [resolvable:$true] %s127_s23 }
   0xd   :  { %v74_v2 = vld [vmem:[#allocation5] sm:$0xff]  ;;  %v75_v3 = vld [vmem:[#allocation5 + $0x8] sm:$0xff]  ;;  %151 = vlog2.f32 %v72_v0  ;;  %v99_v5 = vadd.f32 %v73_v1, %v72_v0  ;;  %v82_v6 = vsub.f32 1.0, %v72_v0  ;;  %v83_v9 = vsub.f32 1.0, %v73_v1  ;;  %s125_s1 = sshll.u32 %s241_s0, 4  ;;  %s126_s1 = int_to_ptr.vmem [resolvable:$true] %s125_s1 }
   0xe   :  { %v96_v4 = vmul.f32 %v74_v2, %v72_v0  ;;  %153 = vlog2.f32 %v73_v1  ;;  %v97_v7 = vmul.f32 %v75_v3, %v73_v1  ;;  %v100_v8 = vadd.f32 %v75_v3, %v74_v2 }
   0xf   :  { %155 = vlog2.f32 %v82_v6  ;;  %112 = vst [vmem:[#allocation7 + $0x8] sm:$0xff] %v99_v5 }
  0x10   :  { %v98_v10 = vadd.f32 %v97_v7, %v96_v4  ;;  %157 = vlog2.f32 %v83_v9  ;;  %116 = vst [vmem:[#allocation7 + $0x10] sm:$0xff] %v100_v8 }
  0x12   :  { %108 = vst [vmem:[#allocation7] sm:$0xff] %v98_v10 }
  0x13   :  { %v152_v11 = vpop.eup %151 }
  0x14   :  { %v154_v12 = vpop.eup %153  ;;  %v77_v13 = vmul.f32 0.6931472, %v152_v11 }
  0x15   :  { %v156_v14 = vpop.eup %155  ;;  %v79_v15 = vmul.f32 0.6931472, %v154_v12 }
  0x16   :  { %v158_v16 = vpop.eup %157  ;;  %v80_v17 = vmax.f32 %v77_v13, -100.0  ;;  %v85_v18 = vmul.f32 0.6931472, %v156_v14 }
  0x17   :  { %v81_v19 = vmax.f32 %v79_v15, -100.0  ;;  %v87_v20 = vmul.f32 0.6931472, %v158_v16 }
  0x18   :  { %v88_v21 = vmax.f32 %v85_v18, -100.0 }
  0x19   :  { %v89_v22 = vmax.f32 %v87_v20, -100.0 }
  0x1a   :  { %v90_v23 = vsub.f32 %v80_v17, %v88_v21 }
  0x1b   :  { %v91_v24 = vsub.f32 %v81_v19, %v89_v22 }
  0x1c   :  { %v92_v25 = vmul.f32 %v90_v23, %v74_v2 }
  0x1d   :  { %v93_v26 = vmul.f32 %v91_v24, %v75_v3 }
  0x1e   :  { %v94_v27 = vadd.f32 %v92_v25, %v88_v21 }
  0x1f   :  { %v95_v28 = vadd.f32 %v93_v26, %v89_v22 }
  0x21   :  { %v101_v29 = vadd.f32 %v95_v28, %v94_v27 }
  0x23   :  { %120 = vst [vmem:[#allocation7 + $0x18] sm:$0xff] %v101_v29 }
  0x24   :  { %133 = dma.vmem_to_hbm [thread:$0]  %s126_s1, 512, %s128_s23, [#allocation4], %s238_s17, %s238_s17, %s239_s18  }
  0x25   :  { %235 = dma.done.wait [#allocation4], 512  }
  0x26   :  { %236 = vsyncadd [#allocation4], 4294966784 }
  0x27   :  { %138 = vsyncpa [#allocation3], 1 }
  0x28   :  { %139 = vsyncpa [#allocation6], 1 }
  0x29   :  { %140 = vsyncpa [#allocation4], 1 }

</bundles_post_ra>
